<compile_context>
chip_gen: v7x
topology: tpu7x:2x2x1
jax: 0.10.0
libtpu: 0.0.40
codegen_flags: <defaults>
</compile_context>

<pallas_src>
import functools

import jax
import jax.numpy as jnp
from jax.experimental import pallas as pl
from jax.experimental.pallas import tpu as pltpu


# ------------------------------ Pallas kernel ---------------------------------
def _sigmoid(x):
    return 1.0 / (1.0 + jnp.exp(-x))


def _shift_lanes_zero(a, s):
    """result[:, i] = a[:, i + s] if 0 <= i + s < a.shape[1] else 0 (static s)."""
    n = a.shape[1]
    if s == 0:
        return a
    if s > 0:
        zeros = jnp.zeros((a.shape[0], s), a.dtype)
        return jnp.concatenate([a[:, s:], zeros], axis=1)
    zeros = jnp.zeros((a.shape[0], -s), a.dtype)
    return jnp.concatenate([zeros, a[:, :n + s]], axis=1)


def _gated_conv_block_kernel(v_in_ref, h_in_ref,
                             w_v_ref, b_v_ref, w_v2h_ref,
                             w_h_ref, b_h_ref, w_h2_ref, b_h2_ref,
                             v_out_ref, h_out_ref,
                             *, height, width, ksize, pad,
                             kh_active, kw_active, out_channels, restricted):
    HW = height * width
    OC = out_channels

    # Flattened x-coordinate of every pixel: used to mask taps that would wrap
    # across image rows after a lane shift.
    xcol = jax.lax.broadcasted_iota(jnp.int32, (1, HW), 1) % width

    def window(a, dy, dx):
        # a[:, y*W + x] -> value at source pixel (y+dy, x+dx), zero outside image.
        shifted = _shift_lanes_zero(a, dy * width + dx)
        if dx == 0:
            return shifted            # vertical overrun is already zero-filled
        valid = (xcol + dx >= 0) & (xcol + dx < width)
        return jnp.where(valid, shifted, 0.0)

    # ---- vertical masked KxK conv: one im2col matmul ---------------------------
    # Kernel rows forced to zero by the 'V'/'VR' mask were dropped host-side.
    v_in = v_in_ref[0]                                   # (C_pad, HW)
    cols = [window(v_in, dh - pad, dw - pad)
            for dh in range(kh_active) for dw in range(ksize)]
    col_v = jnp.concatenate(cols, axis=0)                # (kh_active*K*C_pad, HW)
    # TODO(synk): cast MXU operands to bf16 on v6e/v7x (kept f32 for exactness).
    v_conv = jnp.dot(w_v_ref[...], col_v,
                     preferred_element_type=jnp.float32) + b_v_ref[...]

    # gated activation: relu(second half) * sigmoid(first half)
    v_out_ref[0] = (jnp.maximum(v_conv[OC:, :], 0.0)
                    * _sigmoid(v_conv[:OC, :])).astype(v_out_ref.dtype)

    # ---- horizontal masked (1,K) conv + vertical_to_horizontal 1x1 -------------
    # Output channels of both weights (and the pre-summed bias) were permuted
    # host-side so the per-RGB-group gated activation is a single half split.
    h_in = h_in_ref[0]                                   # (C_pad, HW)
    cols_h = [window(h_in, 0, dw - pad) for dw in range(kw_active)]
    col_h = jnp.concatenate(cols_h, axis=0)              # (kw_active*C_pad, HW)
    h_conv = (jnp.dot(w_h_ref[...], col_h, preferred_element_type=jnp.float32)
              + jnp.dot(w_v2h_ref[...], v_conv, preferred_element_type=jnp.float32)
              + b_h_ref[...])
    h_act = jnp.maximum(h_conv[OC:, :], 0.0) * _sigmoid(h_conv[:OC, :])

    # ---- horizontal_conv_2 (masked 'B' RGB 1x1) + residual ---------------------
    h2 = jnp.dot(w_h2_ref[...], h_act,
                 preferred_element_type=jnp.float32) + b_h2_ref[...]
    if not restricted:
        # re-read the input here instead of keeping it live across the kernel
        h2 = h2 + h_in_ref[0][:OC, :]
    h_out_ref[0] = h2.astype(h_out_ref.dtype)


# ------------------------- host-side weight folding ---------------------------
def _fold_params(raw, *, in_channels, out_channels, kernel_size, restricted, ci_pad):
    """Raw PyTorch-layout masked weights -> lane-/matmul-friendly kernel params."""
    CI, OC, K = in_channels, out_channels, kernel_size
    kh_active = K // 2 if restricted else K // 2 + 1
    kw_active = K // 2 + 1
    t = OC // 3
    # permutation putting all sigmoid-source channels first, relu-source second,
    # with the gated output order (R, G, B) preserved.
    perm = jnp.array([2 * g * t + j for g in range(3) for j in range(t)]
                     + [(2 * g + 1) * t + j for g in range(3) for j in range(t)],
                     dtype=jnp.int32)

    def pad_in(w):  # pad the input-channel axis of an OIHW weight to ci_pad
        return jnp.pad(w, [(0, 0), (0, ci_pad - CI), (0, 0), (0, 0)])

    w_v = pad_in(raw["w_v"])[:, :, :kh_active, :]        # drop masked-zero rows
    w_v_mat = jnp.transpose(w_v, (0, 2, 3, 1)).reshape(2 * OC, kh_active * K * ci_pad)

    w_h = pad_in(raw["w_h"])[:, :, 0, :kw_active]        # drop masked-zero columns
    w_h_mat = jnp.transpose(w_h, (0, 2, 1)).reshape(2 * OC, kw_active * ci_pad)[perm]

    return dict(
        w_v=w_v_mat,
        b_v=raw["b_v"].reshape(2 * OC, 1),
        w_v2h=raw["w_v2h"][:, :, 0, 0][perm],
        w_h=w_h_mat,
        b_h=(raw["b_h"] + raw["b_v2h"])[perm].reshape(2 * OC, 1),  # fold both biases
        w_h2=raw["w_h2"][:, :, 0, 0],
        b_h2=raw["b_h2"].reshape(OC, 1),
    )


# --------------------------------- wrapper ------------------------------------
def gated_conv_block_rgb(v_input, h_input, raw, *, out_channels, kernel_size,
                         padding, restricted=False):
    """v_input, h_input: (N, C_in, H, W) float32 (PyTorch NCHW layout)."""
    N, CI, H, W = v_input.shape
    OC = out_channels
    HW = H * W
    K = kernel_size
    assert padding == (K - 1) // 2, "shape-preserving convs required"
    if not restricted:
        assert CI == OC, "residual add requires in_channels == out_channels"
    # TODO(synk): stride != 1 is not supported.

    kh_active = K // 2 if restricted else K // 2 + 1
    kw_active = K // 2 + 1
    ci_pad = -(-CI // 8) * 8                              # sublane-align channels

    params = _fold_params(raw, in_channels=CI, out_channels=OC,
                          kernel_size=K, restricted=restricted, ci_pad=ci_pad)

    v_flat = v_input.reshape(N, CI, HW)
    h_flat = h_input.reshape(N, CI, HW)
    if ci_pad != CI:
        pad_cfg = [(0, 0), (0, ci_pad - CI), (0, 0)]
        v_flat = jnp.pad(v_flat, pad_cfg)
        h_flat = jnp.pad(h_flat, pad_cfg)

    kernel = functools.partial(
        _gated_conv_block_kernel, height=H, width=W, ksize=K, pad=padding,
        kh_active=kh_active, kw_active=kw_active, out_channels=OC,
        restricted=restricted)

    def act_spec(C):
        return pl.BlockSpec((1, C, HW), lambda n: (n, 0, 0))

    def resident_spec(arr):
        ndim = arr.ndim

        def index_map(n):
            return (0,) * ndim
        return pl.BlockSpec(arr.shape, index_map)

    weight_args = (params["w_v"], params["b_v"], params["w_v2h"],
                   params["w_h"], params["b_h"], params["w_h2"], params["b_h2"])

    flops = 2 * N * HW * (
        (2 * OC) * (kh_active * K * ci_pad)     # vertical conv
        + (2 * OC) * (2 * OC)                   # vertical_to_horizontal 1x1
        + (2 * OC) * (kw_active * ci_pad)       # horizontal conv
        + OC * OC)                              # horizontal_conv_2
    transcendentals = 2 * N * HW * OC           # sigmoids in the two gates
    bytes_accessed = 4 * (2 * N * ci_pad * HW + 2 * N * OC * HW
                          + sum(int(w.size) for w in weight_args))

    v_out, h_out = pl.pallas_call(
        kernel,
        out_shape=(jax.ShapeDtypeStruct((N, OC, HW), jnp.float32),
                   jax.ShapeDtypeStruct((N, OC, HW), jnp.float32)),
        grid=(N,),
        in_specs=[act_spec(ci_pad), act_spec(ci_pad)]
                 + [resident_spec(w) for w in weight_args],
        out_specs=(pl.BlockSpec((1, OC, HW), lambda n: (n, 0, 0)),
                   pl.BlockSpec((1, OC, HW), lambda n: (n, 0, 0))),
        compiler_params=pltpu.CompilerParams(
            dimension_semantics=("parallel",),
            vmem_limit_bytes=32 * 1024 * 1024),
        cost_estimate=pl.CostEstimate(flops=flops,
                                      transcendentals=transcendentals,
                                      bytes_accessed=bytes_accessed),
    )(v_flat, h_flat, *weight_args)

    return v_out.reshape(N, OC, H, W), h_out.reshape(N, OC, H, W)


# --------------------------- pure-JAX reference --------------------------------
def _conv_nchw(x, w_oihw, b, pad_h, pad_w):
    out = jax.lax.conv_general_dilated(
        x, w_oihw, window_strides=(1, 1),
        padding=[(pad_h, pad_h), (pad_w, pad_w)],
        dimension_numbers=("NCHW", "OIHW", "NCHW"))
    return out + b.reshape(1, -1, 1, 1)


def gated_activation_ref(x):
    c = x.shape[1]
    return jnp.maximum(x[:, c // 2:], 0.0) * jax.nn.sigmoid(x[:, :c // 2])


def gated_conv_block_ref(v_input, h_input, raw, *, out_channels, padding, restricted):
    """Mirror of GatedConvBlockRGB.forward (masks already applied to weights)."""
    v_conv = _conv_nchw(v_input, raw["w_v"], raw["b_v"], padding, padding)
    v_out = gated_activation_ref(v_conv)
    v_to_h = _conv_nchw(v_conv, raw["w_v2h"], raw["b_v2h"], 0, 0)
    h_conv = _conv_nchw(h_input, raw["w_h"], raw["b_h"], 0, padding) + v_to_h
    ct = 2 * out_channels // 3
    h_act = jnp.concatenate(
        [gated_activation_ref(h_conv[:, g * ct:(g + 1) * ct]) for g in range(3)],
        axis=1)
    h_conv2 = _conv_nchw(h_act, raw["w_h2"], raw["b_h2"], 0, 0)
    h_out = h_conv2 if restricted else h_conv2 + h_input
    return v_out, h_out


# ----------------------------- parameter setup ---------------------------------
def make_weights(key, in_channels, out_channels, kernel_size, restricted):
    """Random weights with the PixelCNN masks pre-applied (PyTorch OIHW layout)."""
    CI, OC, K = in_channels, out_channels, kernel_size
    assert CI % 3 == 0 and OC % 3 == 0
    ks = jax.random.split(key, 12)

    def rnd(k, shape):
        return 0.1 * jax.random.normal(k, shape, jnp.float32)

    # vertical_conv: MaskedConv2d('V' or 'VR'), CI -> 2*OC, KxK, bias
    kh_active = K // 2 if restricted else K // 2 + 1
    mask_v = jnp.zeros((2 * OC, CI, K, K)).at[:, :, :kh_active, :].set(1.0)
    w_v = rnd(ks[0], (2 * OC, CI, K, K)) * mask_v
    b_v = rnd(ks[1], (2 * OC,))

    # horizontal_conv: MaskedConvRGB('H' or 'HR'), CI -> 2*OC, (1,K), bias
    oc3 = 2 * OC // 3
    if restricted:                       # 'HR_Red' / 'HR_Green' / 'HR_Blue'
        n_center = (0, CI // 3, 2 * CI // 3)
    else:                                # 'H_Red' / 'H_Green' / 'H_Blue'
        n_center = (CI // 3, 2 * CI // 3, CI)
    w_h_groups, b_h_groups = [], []
    for g in range(3):
        m = jnp.zeros((oc3, CI, 1, K)).at[:, :, 0, :K // 2].set(1.0)
        if n_center[g] > 0:
            m = m.at[:, :n_center[g], 0, K // 2].set(1.0)
        w_h_groups.append(rnd(ks[2 + g], (oc3, CI, 1, K)) * m)
        b_h_groups.append(rnd(ks[5 + g], (oc3,)))
    w_h = jnp.concatenate(w_h_groups, axis=0)            # (2*OC, CI, 1, K)
    b_h = jnp.concatenate(b_h_groups, axis=0)            # (2*OC,)

    # vertical_to_horizontal: plain Conv2d(2*OC, 2*OC, 1), bias
    w_v2h = rnd(ks[8], (2 * OC, 2 * OC, 1, 1))
    b_v2h = rnd(ks[9], (2 * OC,))

    # horizontal_conv_2: MaskedConvRGB('B'), OC -> OC, (1,1), bias
    oc3b = OC // 3
    n_in = (OC // 3, 2 * OC // 3, OC)                    # B_Red / B_Green / B_Blue (1x1)
    w_h2_groups = []
    for g in range(3):
        m = jnp.zeros((oc3b, OC, 1, 1)).at[:, :n_in[g], 0, 0].set(1.0)
        w_h2_groups.append(rnd(jax.random.fold_in(ks[10], g), (oc3b, OC, 1, 1)) * m)
    w_h2 = jnp.concatenate(w_h2_groups, axis=0)          # (OC, OC, 1, 1)
    b_h2 = rnd(ks[11], (OC,))

    return dict(w_v=w_v, b_v=b_v, w_h=w_h, b_h=b_h,
                w_v2h=w_v2h, b_v2h=b_v2h, w_h2=w_h2, b_h2=b_h2)


if __name__ == "__main__":
    N, C, H, W = 2, 6, 16, 16                 # channels must be divisible by 3
    kernel_size, stride, padding = 3, 1, 1    # stride must be 1
    restricted = False
    out_channels = C                          # residual add needs in == out

    key = jax.random.PRNGKey(0)
    kv, kh, kp = jax.random.split(key, 3)
    v_input = jax.random.normal(kv, (N, C, H, W), jnp.float32)   # NCHW
    h_input = jax.random.normal(kh, (N, C, H, W), jnp.float32)

    raw = make_weights(kp, C, out_channels, kernel_size, restricted)

    v_out, h_out = gated_conv_block_rgb(
        v_input, h_input, raw, out_channels=out_channels,
        kernel_size=kernel_size, padding=padding, restricted=restricted)
    v_out, h_out = jax.block_until_ready((v_out, h_out))

    v_ref, h_ref = gated_conv_block_ref(
        v_input, h_input, raw, out_channels=out_channels,
        padding=padding, restricted=restricted)

    assert jnp.allclose(v_out, v_ref, atol=1e-4, rtol=1e-4), "v_out mismatch"
    assert jnp.allclose(h_out, h_ref, atol=1e-4, rtol=1e-4), "h_out mismatch"

    print("KERNEL_OK")
</pallas_src>

<mosaic_0001>
module attributes {stable_mosaic.version = 11 : i64} {
  func.func @_gated_conv_block_kernel(%arg0: i32, %arg1: memref<1x8x256xf32, #tpu.memory_space<vmem>>, %arg2: memref<1x8x256xf32, #tpu.memory_space<vmem>>, %arg3: memref<12x48xf32, #tpu.memory_space<vmem>>, %arg4: memref<12x1xf32, #tpu.memory_space<vmem>>, %arg5: memref<12x12xf32, #tpu.memory_space<vmem>>, %arg6: memref<12x16xf32, #tpu.memory_space<vmem>>, %arg7: memref<12x1xf32, #tpu.memory_space<vmem>>, %arg8: memref<6x6xf32, #tpu.memory_space<vmem>>, %arg9: memref<6x1xf32, #tpu.memory_space<vmem>>, %arg10: memref<1x6x256xf32, #tpu.memory_space<vmem>>, %arg11: memref<1x6x256xf32, #tpu.memory_space<vmem>>) attributes {dimension_semantics = [#tpu.dimension_semantics<parallel>], iteration_bounds = array<i64: 2>, scalar_prefetch = 0 : i64, scratch_operands = 0 : i64, tpu.core_type = #tpu.core_type<tc>, window_params = [{transform_indices = @transform_0, window_bounds = array<i64: 1, 8, 256>}, {transform_indices = @transform_1, window_bounds = array<i64: 1, 8, 256>}, {pipeline_mode = #tpu.pipeline_mode<synchronous>, transform_indices = @transform_2, window_bounds = array<i64: 12, 48>}, {pipeline_mode = #tpu.pipeline_mode<synchronous>, transform_indices = @transform_3, window_bounds = array<i64: 12, 1>}, {pipeline_mode = #tpu.pipeline_mode<synchronous>, transform_indices = @transform_4, window_bounds = array<i64: 12, 12>}, {pipeline_mode = #tpu.pipeline_mode<synchronous>, transform_indices = @transform_5, window_bounds = array<i64: 12, 16>}, {pipeline_mode = #tpu.pipeline_mode<synchronous>, transform_indices = @transform_6, window_bounds = array<i64: 12, 1>}, {pipeline_mode = #tpu.pipeline_mode<synchronous>, transform_indices = @transform_7, window_bounds = array<i64: 6, 6>}, {pipeline_mode = #tpu.pipeline_mode<synchronous>, transform_indices = @transform_8, window_bounds = array<i64: 6, 1>}, {transform_indices = @transform_9, window_bounds = array<i64: 1, 6, 256>}, {transform_indices = @transform_10, window_bounds = array<i64: 1, 6, 256>}]} {
    %0 = tpu.iota {dimensions = array<i32: 1>} : vector<1x256xi32>
    %c16_i32 = arith.constant 16 : i32
    %c0_i32 = arith.constant 0 : i32
    %1 = arith.cmpi eq, %c16_i32, %c0_i32 : i32
    %c1_i32 = arith.constant 1 : i32
    %2 = arith.select %1, %c1_i32, %c16_i32 : i32
    %3 = vector.broadcast %2 : i32 to vector<1x256xi32>
    %4 = arith.remsi %0, %3 : vector<1x256xi32>
    %c0_i32_0 = arith.constant 0 : i32
    %5 = vector.broadcast %c0_i32_0 : i32 to vector<1x256xi32>
    %6 = arith.cmpi ne, %4, %5 : vector<1x256xi32>
    %c0_i32_1 = arith.constant 0 : i32
    %7 = vector.broadcast %c0_i32_1 : i32 to vector<1x256xi32>
    %8 = arith.cmpi slt, %4, %7 : vector<1x256xi32>
    %c0_i32_2 = arith.constant 0 : i32
    %9 = arith.cmpi slt, %2, %c0_i32_2 : i32
    %10 = vector.broadcast %9 : i1 to vector<1x256xi1>
    %11 = vector.broadcast %10 : vector<1x256xi1> to vector<1x256xi1>
    %12 = arith.xori %8, %11 : vector<1x256xi1>
    %13 = arith.andi %12, %6 : vector<1x256xi1>
    %14 = vector.broadcast %2 : i32 to vector<1x256xi32>
    %15 = arith.addi %4, %14 : vector<1x256xi32>
    %16 = arith.select %13, %15, %4 : vector<1x256xi1>, vector<1x256xi32>
    %c0 = arith.constant 0 : index
    %c0_3 = arith.constant 0 : index
    %c0_4 = arith.constant 0 : index
    %17 = vector.load %arg1[%c0, %c0_3, %c0_4] : memref<1x8x256xf32, #tpu.memory_space<vmem>>, vector<1x8x256xf32>
    %18 = vector.shape_cast %17 : vector<1x8x256xf32> to vector<8x256xf32>
    %cst = arith.constant 0.000000e+00 : f32
    %19 = vector.broadcast %cst : f32 to vector<8x17xf32>
    %20 = vector.extract_strided_slice %18 {offsets = [0, 0], sizes = [8, 239], strides = [1, 1]} : vector<8x256xf32> to vector<8x239xf32>
    %21 = tpu.concatenate %19, %20 in 1 : vector<8x17xf32>, vector<8x239xf32> -> vector<8x256xf32>
    %c-1_i32 = arith.constant -1 : i32
    %22 = vector.broadcast %c-1_i32 : i32 to vector<1x256xi32>
    %23 = arith.addi %16, %22 : vector<1x256xi32>
    %c0_i32_5 = arith.constant 0 : i32
    %24 = vector.broadcast %c0_i32_5 : i32 to vector<1x256xi32>
    %25 = arith.cmpi sge, %23, %24 : vector<1x256xi32>
    %c-1_i32_6 = arith.constant -1 : i32
    %26 = vector.broadcast %c-1_i32_6 : i32 to vector<1x256xi32>
    %27 = arith.addi %16, %26 : vector<1x256xi32>
    %c16_i32_7 = arith.constant 16 : i32
    %28 = vector.broadcast %c16_i32_7 : i32 to vector<1x256xi32>
    %29 = arith.cmpi slt, %27, %28 : vector<1x256xi32>
    %30 = arith.andi %25, %29 : vector<1x256xi1>
    %cst_8 = arith.constant 0.000000e+00 : f32
    %31 = vector.shape_cast %30 : vector<1x256xi1> to vector<1x256xi1>
    %32 = vector.broadcast %31 : vector<1x256xi1> to vector<8x256xi1>
    %33 = vector.broadcast %cst_8 : f32 to vector<8x256xf32>
    %34 = arith.select %32, %21, %33 : vector<8x256xi1>, vector<8x256xf32>
    %cst_9 = arith.constant 0.000000e+00 : f32
    %35 = vector.broadcast %cst_9 : f32 to vector<8x16xf32>
    %36 = vector.extract_strided_slice %18 {offsets = [0, 0], sizes = [8, 240], strides = [1, 1]} : vector<8x256xf32> to vector<8x240xf32>
    %37 = tpu.concatenate %35, %36 in 1 : vector<8x16xf32>, vector<8x240xf32> -> vector<8x256xf32>
    %cst_10 = arith.constant 0.000000e+00 : f32
    %38 = vector.broadcast %cst_10 : f32 to vector<8x15xf32>
    %39 = vector.extract_strided_slice %18 {offsets = [0, 0], sizes = [8, 241], strides = [1, 1]} : vector<8x256xf32> to vector<8x241xf32>
    %40 = tpu.concatenate %38, %39 in 1 : vector<8x15xf32>, vector<8x241xf32> -> vector<8x256xf32>
    %c1_i32_11 = arith.constant 1 : i32
    %41 = vector.broadcast %c1_i32_11 : i32 to vector<1x256xi32>
    %42 = arith.addi %16, %41 : vector<1x256xi32>
    %c0_i32_12 = arith.constant 0 : i32
    %43 = vector.broadcast %c0_i32_12 : i32 to vector<1x256xi32>
    %44 = arith.cmpi sge, %42, %43 : vector<1x256xi32>
    %c1_i32_13 = arith.constant 1 : i32
    %45 = vector.broadcast %c1_i32_13 : i32 to vector<1x256xi32>
    %46 = arith.addi %16, %45 : vector<1x256xi32>
    %c16_i32_14 = arith.constant 16 : i32
    %47 = vector.broadcast %c16_i32_14 : i32 to vector<1x256xi32>
    %48 = arith.cmpi slt, %46, %47 : vector<1x256xi32>
    %49 = arith.andi %44, %48 : vector<1x256xi1>
    %cst_15 = arith.constant 0.000000e+00 : f32
    %50 = vector.shape_cast %49 : vector<1x256xi1> to vector<1x256xi1>
    %51 = vector.broadcast %50 : vector<1x256xi1> to vector<8x256xi1>
    %52 = vector.broadcast %cst_15 : f32 to vector<8x256xf32>
    %53 = arith.select %51, %40, %52 : vector<8x256xi1>, vector<8x256xf32>
    %cst_16 = arith.constant 0.000000e+00 : f32
    %54 = vector.broadcast %cst_16 : f32 to vector<8x1xf32>
    %55 = vector.extract_strided_slice %18 {offsets = [0, 0], sizes = [8, 255], strides = [1, 1]} : vector<8x256xf32> to vector<8x255xf32>
    %56 = tpu.concatenate %54, %55 in 1 : vector<8x1xf32>, vector<8x255xf32> -> vector<8x256xf32>
    %c-1_i32_17 = arith.constant -1 : i32
    %57 = vector.broadcast %c-1_i32_17 : i32 to vector<1x256xi32>
    %58 = arith.addi %16, %57 : vector<1x256xi32>
    %c0_i32_18 = arith.constant 0 : i32
    %59 = vector.broadcast %c0_i32_18 : i32 to vector<1x256xi32>
    %60 = arith.cmpi sge, %58, %59 : vector<1x256xi32>
    %c-1_i32_19 = arith.constant -1 : i32
    %61 = vector.broadcast %c-1_i32_19 : i32 to vector<1x256xi32>
    %62 = arith.addi %16, %61 : vector<1x256xi32>
    %c16_i32_20 = arith.constant 16 : i32
    %63 = vector.broadcast %c16_i32_20 : i32 to vector<1x256xi32>
    %64 = arith.cmpi slt, %62, %63 : vector<1x256xi32>
    %65 = arith.andi %60, %64 : vector<1x256xi1>
    %cst_21 = arith.constant 0.000000e+00 : f32
    %66 = vector.shape_cast %65 : vector<1x256xi1> to vector<1x256xi1>
    %67 = vector.broadcast %66 : vector<1x256xi1> to vector<8x256xi1>
    %68 = vector.broadcast %cst_21 : f32 to vector<8x256xf32>
    %69 = arith.select %67, %56, %68 : vector<8x256xi1>, vector<8x256xf32>
    %cst_22 = arith.constant 0.000000e+00 : f32
    %70 = vector.broadcast %cst_22 : f32 to vector<8x1xf32>
    %71 = vector.extract_strided_slice %18 {offsets = [0, 1], sizes = [8, 255], strides = [1, 1]} : vector<8x256xf32> to vector<8x255xf32>
    %72 = tpu.concatenate %71, %70 in 1 : vector<8x255xf32>, vector<8x1xf32> -> vector<8x256xf32>
    %c1_i32_23 = arith.constant 1 : i32
    %73 = vector.broadcast %c1_i32_23 : i32 to vector<1x256xi32>
    %74 = arith.addi %16, %73 : vector<1x256xi32>
    %c0_i32_24 = arith.constant 0 : i32
    %75 = vector.broadcast %c0_i32_24 : i32 to vector<1x256xi32>
    %76 = arith.cmpi sge, %74, %75 : vector<1x256xi32>
    %c1_i32_25 = arith.constant 1 : i32
    %77 = vector.broadcast %c1_i32_25 : i32 to vector<1x256xi32>
    %78 = arith.addi %16, %77 : vector<1x256xi32>
    %c16_i32_26 = arith.constant 16 : i32
    %79 = vector.broadcast %c16_i32_26 : i32 to vector<1x256xi32>
    %80 = arith.cmpi slt, %78, %79 : vector<1x256xi32>
    %81 = arith.andi %76, %80 : vector<1x256xi1>
    %cst_27 = arith.constant 0.000000e+00 : f32
    %82 = vector.shape_cast %81 : vector<1x256xi1> to vector<1x256xi1>
    %83 = vector.broadcast %82 : vector<1x256xi1> to vector<8x256xi1>
    %84 = vector.broadcast %cst_27 : f32 to vector<8x256xf32>
    %85 = arith.select %83, %72, %84 : vector<8x256xi1>, vector<8x256xf32>
    %86 = tpu.concatenate %34, %37, %53, %69, %18, %85 in 0 : vector<8x256xf32>, vector<8x256xf32>, vector<8x256xf32>, vector<8x256xf32>, vector<8x256xf32>, vector<8x256xf32> -> vector<48x256xf32>
    %c0_28 = arith.constant 0 : index
    %c0_29 = arith.constant 0 : index
    %87 = vector.load %arg3[%c0_28, %c0_29] : memref<12x48xf32, #tpu.memory_space<vmem>>, vector<12x48xf32>
    %cst_30 = arith.constant dense<0.000000e+00> : vector<12x256xf32>
    %88 = tpu.matmul %87, %86, %cst_30 {dimension_numbers = #tpu.dot_dimension_numbers<[1], [0], [0], [1], [0, 0, 1, 1], [], []>} : vector<12x48xf32>, vector<48x256xf32>, vector<12x256xf32> -> vector<12x256xf32>
    %c0_31 = arith.constant 0 : index
    %c0_32 = arith.constant 0 : index
    %89 = vector.load %arg4[%c0_31, %c0_32] : memref<12x1xf32, #tpu.memory_space<vmem>>, vector<12x1xf32>
    %90 = vector.broadcast %89 : vector<12x1xf32> to vector<12x256xf32>
    %91 = arith.addf %88, %90 : vector<12x256xf32>
    %92 = vector.extract_strided_slice %91 {offsets = [6, 0], sizes = [6, 256], strides = [1, 1]} : vector<12x256xf32> to vector<6x256xf32>
    %cst_33 = arith.constant 0.000000e+00 : f32
    %93 = vector.broadcast %cst_33 : f32 to vector<6x256xf32>
    %94 = arith.maximumf %92, %93 : vector<6x256xf32>
    %95 = vector.extract_strided_slice %91 {offsets = [0, 0], sizes = [6, 256], strides = [1, 1]} : vector<12x256xf32> to vector<6x256xf32>
    %cst_34 = arith.constant 0.000000e+00 : f32
    %96 = vector.broadcast %cst_34 : f32 to vector<6x256xf32>
    %97 = arith.subf %96, %95 : vector<6x256xf32>
    %98 = math.exp %97 : vector<6x256xf32>
    %cst_35 = arith.constant 1.000000e+00 : f32
    %99 = vector.broadcast %cst_35 : f32 to vector<6x256xf32>
    %100 = arith.addf %99, %98 : vector<6x256xf32>
    %cst_36 = arith.constant 1.000000e+00 : f32
    %101 = vector.broadcast %cst_36 : f32 to vector<6x256xf32>
    %102 = arith.divf %101, %100 : vector<6x256xf32>
    %103 = arith.mulf %94, %102 : vector<6x256xf32>
    %c0_37 = arith.constant 0 : index
    %c0_38 = arith.constant 0 : index
    %c0_39 = arith.constant 0 : index
    %104 = vector.load %arg10[%c0_37, %c0_38, %c0_39] : memref<1x6x256xf32, #tpu.memory_space<vmem>>, vector<1x6x256xf32>
    %105 = vector.shape_cast %104 : vector<1x6x256xf32> to vector<6x256xf32>
    %106 = vector.shape_cast %103 : vector<6x256xf32> to vector<1x6x256xf32>
    tpu.vector_store %arg10[%c0_37, %c0_38, %c0_39], %106 {strides = array<i32>} : memref<1x6x256xf32, #tpu.memory_space<vmem>>, vector<1x6x256xf32>,
    %c0_40 = arith.constant 0 : index
    %c0_41 = arith.constant 0 : index
    %c0_42 = arith.constant 0 : index
    %107 = vector.load %arg2[%c0_40, %c0_41, %c0_42] : memref<1x8x256xf32, #tpu.memory_space<vmem>>, vector<1x8x256xf32>
    %108 = vector.shape_cast %107 : vector<1x8x256xf32> to vector<8x256xf32>
    %cst_43 = arith.constant 0.000000e+00 : f32
    %109 = vector.broadcast %cst_43 : f32 to vector<8x1xf32>
    %110 = vector.extract_strided_slice %108 {offsets = [0, 0], sizes = [8, 255], strides = [1, 1]} : vector<8x256xf32> to vector<8x255xf32>
    %111 = tpu.concatenate %109, %110 in 1 : vector<8x1xf32>, vector<8x255xf32> -> vector<8x256xf32>
    %c-1_i32_44 = arith.constant -1 : i32
    %112 = vector.broadcast %c-1_i32_44 : i32 to vector<1x256xi32>
    %113 = arith.addi %16, %112 : vector<1x256xi32>
    %c0_i32_45 = arith.constant 0 : i32
    %114 = vector.broadcast %c0_i32_45 : i32 to vector<1x256xi32>
    %115 = arith.cmpi sge, %113, %114 : vector<1x256xi32>
    %c-1_i32_46 = arith.constant -1 : i32
    %116 = vector.broadcast %c-1_i32_46 : i32 to vector<1x256xi32>
    %117 = arith.addi %16, %116 : vector<1x256xi32>
    %c16_i32_47 = arith.constant 16 : i32
    %118 = vector.broadcast %c16_i32_47 : i32 to vector<1x256xi32>
    %119 = arith.cmpi slt, %117, %118 : vector<1x256xi32>
    %120 = arith.andi %115, %119 : vector<1x256xi1>
    %cst_48 = arith.constant 0.000000e+00 : f32
    %121 = vector.shape_cast %120 : vector<1x256xi1> to vector<1x256xi1>
    %122 = vector.broadcast %121 : vector<1x256xi1> to vector<8x256xi1>
    %123 = vector.broadcast %cst_48 : f32 to vector<8x256xf32>
    %124 = arith.select %122, %111, %123 : vector<8x256xi1>, vector<8x256xf32>
    %125 = tpu.concatenate %124, %108 in 0 : vector<8x256xf32>, vector<8x256xf32> -> vector<16x256xf32>
    %c0_49 = arith.constant 0 : index
    %c0_50 = arith.constant 0 : index
    %126 = vector.load %arg6[%c0_49, %c0_50] : memref<12x16xf32, #tpu.memory_space<vmem>>, vector<12x16xf32>
    %cst_51 = arith.constant dense<0.000000e+00> : vector<12x256xf32>
    %127 = tpu.matmul %126, %125, %cst_51 {dimension_numbers = #tpu.dot_dimension_numbers<[1], [0], [0], [1], [0, 0, 1, 1], [], []>} : vector<12x16xf32>, vector<16x256xf32>, vector<12x256xf32> -> vector<12x256xf32>
    %c0_52 = arith.constant 0 : index
    %c0_53 = arith.constant 0 : index
    %128 = vector.load %arg5[%c0_52, %c0_53] : memref<12x12xf32, #tpu.memory_space<vmem>>, vector<12x12xf32>
    %cst_54 = arith.constant dense<0.000000e+00> : vector<12x256xf32>
    %129 = tpu.matmul %128, %91, %cst_54 {dimension_numbers = #tpu.dot_dimension_numbers<[1], [0], [0], [1], [0, 0, 1, 1], [], []>} : vector<12x12xf32>, vector<12x256xf32>, vector<12x256xf32> -> vector<12x256xf32>
    %130 = arith.addf %127, %129 : vector<12x256xf32>
    %c0_55 = arith.constant 0 : index
    %c0_56 = arith.constant 0 : index
    %131 = vector.load %arg7[%c0_55, %c0_56] : memref<12x1xf32, #tpu.memory_space<vmem>>, vector<12x1xf32>
    %132 = vector.broadcast %131 : vector<12x1xf32> to vector<12x256xf32>
    %133 = arith.addf %130, %132 : vector<12x256xf32>
    %134 = vector.extract_strided_slice %133 {offsets = [6, 0], sizes = [6, 256], strides = [1, 1]} : vector<12x256xf32> to vector<6x256xf32>
    %cst_57 = arith.constant 0.000000e+00 : f32
    %135 = vector.broadcast %cst_57 : f32 to vector<6x256xf32>
    %136 = arith.maximumf %134, %135 : vector<6x256xf32>
    %137 = vector.extract_strided_slice %133 {offsets = [0, 0], sizes = [6, 256], strides = [1, 1]} : vector<12x256xf32> to vector<6x256xf32>
    %cst_58 = arith.constant 0.000000e+00 : f32
    %138 = vector.broadcast %cst_58 : f32 to vector<6x256xf32>
    %139 = arith.subf %138, %137 : vector<6x256xf32>
    %140 = math.exp %139 : vector<6x256xf32>
    %cst_59 = arith.constant 1.000000e+00 : f32
    %141 = vector.broadcast %cst_59 : f32 to vector<6x256xf32>
    %142 = arith.addf %141, %140 : vector<6x256xf32>
    %cst_60 = arith.constant 1.000000e+00 : f32
    %143 = vector.broadcast %cst_60 : f32 to vector<6x256xf32>
    %144 = arith.divf %143, %142 : vector<6x256xf32>
    %145 = arith.mulf %136, %144 : vector<6x256xf32>
    %c0_61 = arith.constant 0 : index
    %c0_62 = arith.constant 0 : index
    %146 = vector.load %arg8[%c0_61, %c0_62] : memref<6x6xf32, #tpu.memory_space<vmem>>, vector<6x6xf32>
    %cst_63 = arith.constant dense<0.000000e+00> : vector<6x256xf32>
    %147 = tpu.matmul %146, %145, %cst_63 {dimension_numbers = #tpu.dot_dimension_numbers<[1], [0], [0], [1], [0, 0, 1, 1], [], []>} : vector<6x6xf32>, vector<6x256xf32>, vector<6x256xf32> -> vector<6x256xf32>
    %c0_64 = arith.constant 0 : index
    %c0_65 = arith.constant 0 : index
    %148 = vector.load %arg9[%c0_64, %c0_65] : memref<6x1xf32, #tpu.memory_space<vmem>>, vector<6x1xf32>
    %149 = vector.broadcast %148 : vector<6x1xf32> to vector<6x256xf32>
    %150 = arith.addf %147, %149 : vector<6x256xf32>
    %c0_66 = arith.constant 0 : index
    %c0_67 = arith.constant 0 : index
    %c0_68 = arith.constant 0 : index
    %151 = vector.load %arg2[%c0_66, %c0_67, %c0_68] : memref<1x8x256xf32, #tpu.memory_space<vmem>>, vector<1x8x256xf32>
    %152 = vector.shape_cast %151 : vector<1x8x256xf32> to vector<8x256xf32>
    %153 = vector.extract_strided_slice %152 {offsets = [0, 0], sizes = [6, 256], strides = [1, 1]} : vector<8x256xf32> to vector<6x256xf32>
    %154 = arith.addf %150, %153 : vector<6x256xf32>
    %c0_69 = arith.constant 0 : index
    %c0_70 = arith.constant 0 : index
    %c0_71 = arith.constant 0 : index
    %155 = vector.load %arg11[%c0_69, %c0_70, %c0_71] : memref<1x6x256xf32, #tpu.memory_space<vmem>>, vector<1x6x256xf32>
    %156 = vector.shape_cast %155 : vector<1x6x256xf32> to vector<6x256xf32>
    %157 = vector.shape_cast %154 : vector<6x256xf32> to vector<1x6x256xf32>
    tpu.vector_store %arg11[%c0_69, %c0_70, %c0_71], %157 {strides = array<i32>} : memref<1x6x256xf32, #tpu.memory_space<vmem>>, vector<1x6x256xf32>,
    return
  }
  func.func @transform_0(%arg0: i32) -> (i32, i32, i32) {
    %c0_i32 = arith.constant 0 : i32
    %c0_i32_0 = arith.constant 0 : i32
    %c0_i32_1 = arith.constant 0 : i32
    return %arg0, %c0_i32, %c0_i32_0 : i32, i32, i32
  }
  func.func @transform_1(%arg0: i32) -> (i32, i32, i32) {
    %c0_i32 = arith.constant 0 : i32
    %c0_i32_0 = arith.constant 0 : i32
    %c0_i32_1 = arith.constant 0 : i32
    return %arg0, %c0_i32, %c0_i32_0 : i32, i32, i32
  }
  func.func @transform_2(%arg0: i32) -> (i32, i32) {
    %c0_i32 = arith.constant 0 : i32
    %c0_i32_0 = arith.constant 0 : i32
    %c0_i32_1 = arith.constant 0 : i32
    return %c0_i32, %c0_i32_0 : i32, i32
  }
  func.func @transform_3(%arg0: i32) -> (i32, i32) {
    %c0_i32 = arith.constant 0 : i32
    %c0_i32_0 = arith.constant 0 : i32
    %c0_i32_1 = arith.constant 0 : i32
    return %c0_i32, %c0_i32_0 : i32, i32
  }
  func.func @transform_4(%arg0: i32) -> (i32, i32) {
    %c0_i32 = arith.constant 0 : i32
    %c0_i32_0 = arith.constant 0 : i32
    %c0_i32_1 = arith.constant 0 : i32
    return %c0_i32, %c0_i32_0 : i32, i32
  }
  func.func @transform_5(%arg0: i32) -> (i32, i32) {
    %c0_i32 = arith.constant 0 : i32
    %c0_i32_0 = arith.constant 0 : i32
    %c0_i32_1 = arith.constant 0 : i32
    return %c0_i32, %c0_i32_0 : i32, i32
  }
  func.func @transform_6(%arg0: i32) -> (i32, i32) {
    %c0_i32 = arith.constant 0 : i32
    %c0_i32_0 = arith.constant 0 : i32
    %c0_i32_1 = arith.constant 0 : i32
    return %c0_i32, %c0_i32_0 : i32, i32
  }
  func.func @transform_7(%arg0: i32) -> (i32, i32) {
    %c0_i32 = arith.constant 0 : i32
    %c0_i32_0 = arith.constant 0 : i32
    %c0_i32_1 = arith.constant 0 : i32
    return %c0_i32, %c0_i32_0 : i32, i32
  }
  func.func @transform_8(%arg0: i32) -> (i32, i32) {
    %c0_i32 = arith.constant 0 : i32
    %c0_i32_0 = arith.constant 0 : i32
    %c0_i32_1 = arith.constant 0 : i32
    return %c0_i32, %c0_i32_0 : i32, i32
  }
  func.func @transform_9(%arg0: i32) -> (i32, i32, i32) {
    %c0_i32 = arith.constant 0 : i32
    %c0_i32_0 = arith.constant 0 : i32
    %c0_i32_1 = arith.constant 0 : i32
    return %arg0, %c0_i32, %c0_i32_0 : i32, i32, i32
  }
  func.func @transform_10(%arg0: i32) -> (i32, i32, i32) {
    %c0_i32 = arith.constant 0 : i32
    %c0_i32_0 = arith.constant 0 : i32
    %c0_i32_1 = arith.constant 0 : i32
    return %arg0, %c0_i32, %c0_i32_0 : i32, i32, i32
  }
}

</mosaic_0001>

<bundles_post_ra>
// kernel: tpu_custom_call.1
= control target key start
LH: loop header
LB: loop body
LE: loop exit
PB: predicated region body
PF: predicated region fallthrough
CT: control target
= control target key end

     0   :  { %16 = vsyncpa [#allocation3], 0  ;;  %s1827_s0 = inlined_call_operand.vmem [shape: f32[2,8,256], index: 0, kind: input, shape index: {}]   ;;  %s1828_s1 = inlined_call_operand.hbm [shape: f32[2,8,256], index: 1, kind: input, shape index: {}]   ;;  %s1829_s2 = inlined_call_operand.vmem [shape: f32[12,48], index: 2, kind: input, shape index: {}]   ;;  %s1830_s3 = inlined_call_operand.vmem [shape: f32[12,1], index: 3, kind: input, shape index: {}]   ;;  %s1831_s4 = inlined_call_operand.hbm [shape: f32[12,12], index: 4, kind: input, shape index: {}]   ;;  %s1832_s5 = inlined_call_operand.hbm [shape: f32[12,16], index: 5, kind: input, shape index: {}]   ;;  %s1833_s6 = inlined_call_operand.vmem [shape: f32[12,1], index: 6, kind: input, shape index: {}]   ;;  %s1834_s7 = inlined_call_operand.vmem [shape: f32[6,6], index: 7, kind: input, shape index: {}]   ;;  %s1835_s8 = inlined_call_operand.vmem [shape: f32[6,1], index: 8, kind: input, shape index: {}]   ;;  %s1836_s9 = inlined_call_operand.vmem [shape: f32[2,6,256], index: 9, kind: output, shape index: {0}]   ;;  %s1837_s10 = inlined_call_operand.vmem [shape: f32[2,6,256], index: 10, kind: output, shape index: {1}]  }
   0x1   :  { %18 = vsyncpa [#allocation3 + $0x1], 0 }
   0x2   :  { %19 = vsyncpa [#allocation5], 0  ;;  %s1546_s13 = smov 0   ;;  %s1548_s14 = smov 0  }
   0x3   :  { %s1550_s15 = smov 0   ;;  %s1552_s16 = smov 0  }
   0x4 LB: > { %s1565_s17 = sadd.s32 4294967295, %s1476_s16   ;;  %p71_p0 = scmp.ne.s32.totalorder %s1468_s14, %s1464_s13  ;;  %s1476_s16 = sphi %s1552_s16, %s1854_s16   ;;  %s1472_s15 = sphi %s1550_s15, %s1853_s15   ;;  %s1468_s14 = sphi %s1548_s14, %s1852_s14   ;;  %s1464_s13 = sphi %s1546_s13, %s1851_s13  }
   0x5   : > { %p1838_p1 = scmp.eq.s32.totalorder %s1565_s17, 0  ;;  %p1154_p2 = scmp.ge.s32.totalorder %s1476_s16, 1 }
   0x6   : > { %p281_p3 = scmp.lt.s32.totalorder %s1476_s16, 3  ;;  %s1478_s20 = smov [#allocation4]  }
   0x7   : > { %p1573_p4 = por %p1838_p1, %p71_p0  ;;  %s299_s21 = sshll.u32 %s1478_s20, 4  ;;  %s300_s21 = int_to_ptr.vmem [resolvable:$true] %s299_s21 }
   0x8   : > { %p1577_p5 = pnand %p1154_p2, %p281_p3  ;;  %s1479_s23 = smov [#allocation6]  }
   0x9   : > { %s1841_s18 = scalar_select %p1573_p4, 1, 0 }
   0xa   : > { %s1842_s19 = scalar_select %p1577_p5, 1, 0 }
   0xb   : > { %p1244_p6 = pneg %p1577_p5  ;;  %s312_s24 = sshll.u32 %s1479_s23, 4  ;;  %s1589_s24 = int_to_ptr.vmem [resolvable:$true] %s312_s24 }
   0xc   : > { %s1352_s27 = scalar_lea.hbm %s1831_s4, 256 }
   0xd   : > { %p1585_p7 = pnand %p1244_p6, %p1838_p1  ;;  %p1353_p8 = scmp.ne.s32.totalorder %s1831_s4, %s1352_s27 }
   0xe   : > { %p1359_p12 = scmp.lt.u32.totalorder %s1352_s27, %s1831_s4 }
   0xf   : > { %p1354_p9 = pneg %p1585_p7 }
  0x11   : > { %p1355_p10 = pnand %p1354_p9, %p1353_p8 }
  0x13   : > { %p1356_p11 = pneg %p1355_p10 }
  0x15   : > { %p1361_p13 = pnand %p1359_p12, %p1356_p11 }
  0x17   : > { %1364 = shalt.err (!%p1361_p13)
}
  0x18   : > { %s1365_s12 = scalar_lea.vmem %s300_s21, 256  ;;  %p1373_p6 = scmp.lt.s32.totalorder %s300_s21, %s300_s21 }
  0x19   : > { %p1366_p0 = scmp.ne.s32.totalorder %s300_s21, %s1365_s12  ;;  %p1374_p1 = scmp.lt.s32.totalorder %s1365_s12, %s1365_s12 }
  0x1b   : > { %p1368_p2 = pnand %p1366_p0, %p1354_p9  ;;  %p1375_p4 = por %p1374_p1, %p1373_p6 }
  0x1d   : > { %p1369_p3 = pneg %p1368_p2 }
  0x1f   : > { %p1376_p5 = pnand %p1375_p4, %p1369_p3 }
  0x21   : > { %1379 = shalt.err (!%p1376_p5)
}
  0x22   : > { %s1480_s13 = smov 128   ;;  %s1481_s20 = smov 8  }
  0x23   : > { %1247 = dma.hbm_to_vmem [thread:$0]  (!%p1585_p7), %s1831_s4, 256, %s300_s21, [#allocation5], %s1480_s13, %s1480_s13, %s1481_s20  }
  0x24   : > { %s1380_s28 = scalar_lea.hbm %s1832_s5, 256 }
  0x25   : > { %p1381_p8 = scmp.ne.s32.totalorder %s1832_s5, %s1380_s28  ;;  %p1387_p5 = scmp.lt.u32.totalorder %s1380_s28, %s1832_s5 }
  0x27   : > { %p1383_p1 = pnand %p1381_p8, %p1354_p9 }
  0x29   : > { %p1384_p4 = pneg %p1383_p1 }
  0x2b   : > { %p1389_p10 = pnand %p1387_p5, %p1384_p4 }
  0x2d   : > { %1392 = shalt.err (!%p1389_p10)
}
  0x2e   : > { %s1393_s21 = scalar_lea.vmem %s1589_s24, 256  ;;  %p1401_p0 = scmp.lt.s32.totalorder %s1589_s24, %s1589_s24 }
  0x2f   : > { %p1394_p11 = scmp.ne.s32.totalorder %s1589_s24, %s1393_s21  ;;  %p1402_p2 = scmp.lt.s32.totalorder %s1393_s21, %s1393_s21 }
  0x31   : > { %p1396_p12 = pnand %p1394_p11, %p1354_p9  ;;  %p1403_p3 = por %p1402_p2, %p1401_p0 }
  0x33   : > { %p1397_p13 = pneg %p1396_p12 }
  0x35   : > { %p1404_p6 = pnand %p1403_p3, %p1397_p13 }
  0x37   : > { %1407 = shalt.err (!%p1404_p6)
}
  0x38   : > { %1250 = dma.hbm_to_vmem [thread:$0]  (!%p1585_p7), %s1832_s5, 256, %s1589_s24, [#allocation5], %s1480_s13, %s1480_s13, %s1481_s20  }
  0x39   : > { %s1639_s26 = sadd.s32 1, %s1476_s16   ;;  %s58_s27 = sadd.s32 1, %s1472_s15 }
  0x3a   : > { %s55_s22 = ssub.s32 %s1476_s16, %s1639_s26  ;;  %p65_p9 = scmp.ne.s32.totalorder %s1472_s15, %s1468_s14 }
  0x3b   : > { %p56_p8 = scmp.eq.s32.totalorder %s55_s22, 0  ;;  %p66_p1 = scmp.eq.s32.totalorder %s1476_s16, 0 }
  0x3c   : > { %p1257_p4 = scmp.lt.s32.totalorder %s1476_s16, 2  ;;  %s343_s28 = sand.u32 1, %s1472_s15  }
  0x3d   : > { %s1650_s29 = scalar_select %p56_p8, %s1472_s15, %s58_s27  }
  0x3e   : > { %p67_p5 = por %p66_p1, %p65_p9  ;;  %s1158_s30 = sshll.u32 %s343_s28, 4 }
  0x3f   : > { %s1196_s11 = sshll.u32 %s1476_s16, 8  ;;  %s347_s24 = scalar_lea.vmem [#allocation2], %s1158_s30 }
  0x40   : > { %s1656_s23 = scalar_lea.hbm %s1828_s1, %s1196_s11  ;;  %s355_s13 = sshll.u32 %s347_s24, 4  ;;  %s1662_s13 = int_to_ptr.vmem [resolvable:$true] %s355_s13 }
  0x41   : > { %p1658_p7 = pnand %p1257_p4, %p67_p5  ;;  %s344_s16 = scalar_lea.sflag [#allocation3], %s343_s28 }
  0x42   : > { %s1408_s25 = scalar_lea.hbm %s1656_s23, 256  ;;  %s1413_s30 = scalar_lea.hbm %s1828_s1, 512 }
  0x43   : > { %p1409_p10 = scmp.ne.s32.totalorder %s1656_s23, %s1408_s25  ;;  %p1410_p11 = pneg %p1658_p7 }
  0x44   : > { %p1414_p0 = scmp.lt.u32.totalorder %s1656_s23, %s1828_s1  ;;  %p1415_p2 = scmp.lt.u32.totalorder %s1413_s30, %s1408_s25 }
  0x45   : > { %p1411_p12 = pnand %p1410_p11, %p1409_p10  ;;  %p1417_p6 = scmp.lt.u32.totalorder %s1408_s25, %s1656_s23 }
  0x46   : > { %p1416_p3 = por %p1415_p2, %p1414_p0 }
  0x47   : > { %p1412_p13 = pneg %p1411_p12 }
  0x48   : > { %p1418_p9 = por %p1417_p6, %p1416_p3 }
  0x4a   : > { %p1419_p8 = pnand %p1418_p9, %p1412_p13 }
  0x4c   : > { %1422 = shalt.err (!%p1419_p8)
}
  0x4d   : > { %s1423_s28 = scalar_lea.vmem %s1662_s13, 256  ;;  %s1482_s21 = smov [#allocation2]  }
  0x4e   : > { %p1424_p1 = scmp.ne.s32.totalorder %s1662_s13, %s1423_s28  ;;  %s1428_s24 = sshll.u32 %s1482_s21, 4  ;;  %s1429_s24 = int_to_ptr.vmem [resolvable:$false] %s1428_s24 }
  0x4f   : > { %s1430_s27 = scalar_lea.vmem %s1429_s24, 512  ;;  %p1431_p10 = scmp.lt.s32.totalorder %s1662_s13, %s1429_s24 }
  0x50   : > { %p1426_p4 = pnand %p1424_p1, %p1410_p11  ;;  %p1432_p12 = scmp.lt.s32.totalorder %s1430_s27, %s1423_s28 }
  0x52   : > { %p1427_p5 = pneg %p1426_p4  ;;  %p1433_p0 = por %p1432_p12, %p1431_p10 }
  0x54   : > { %p1434_p2 = pnand %p1433_p0, %p1427_p5 }
  0x56   : > { %1437 = shalt.err (!%p1434_p2)
}
  0x57   : > { %1254 = dma.hbm_to_vmem [thread:$0]  (!%p1658_p7), %s1656_s23, 256, %s1662_s13, %s344_s16  }
  0x58   : > { %p1845_p13 = scmp.ne.s32.totalorder %s1842_s19, 0 }
  0x59   : > { %s366_s25 = sand.u32 (!%p1845_p13), 1, %s1468_s14   ;;  %p1846_p11 = scmp.ne.s32.totalorder (!%p1845_p13), %s1841_s18, 0 }
  0x5a   : > { %364 = sbr.rel (%p1845_p13) target bundleno = 948 (0x3b4), region = 56  ;;  %s1692_s22 = sshll.u32 (!%p1845_p13), %s366_s25, 4 }
  0x5b   : > { %s367_s30 = scalar_lea.sflag (!%p1845_p13), [#allocation3], %s366_s25  ;;  %s370_s11 = scalar_lea.vmem (!%p1845_p13), [#allocation2], %s1692_s22 }
  0x61   : > { %1455 = dma.done.wait (%p1846_p11), %s367_s30, 256  }
  0x62   : > { %1457 = vsyncadd (%p1846_p11), %s367_s30, 4294967040  ;;  %p1847_p3 = scmp.eq.s32.totalorder %s1565_s17, 0 }
  0x64   : > { %1459 = dma.done.wait (%p1847_p3), [#allocation5], 512   ;;  %p1848_p7 = pmov %p1847_p3 }
  0x65   : > { %p425_p6 = scmp.lt.s32.totalorder %s1565_s17, 1  ;;  %s1483_s18 = smov 15   ;;  %v1487_v4 = vmov 0.0   ;;  %v550_v5 = vld [vmem:[%s1830_s3] sm:$0xff]  ;;  %v1726_v7 = vld [vmem:[%s370_s11 + $0x8] sm:$0xff]  ;;  %v1489_v8 = vmov 0   ;;  %v440_v14 = vlaneseq }
  0x66   : > { %1461 = vsyncadd (%p1848_p7), [#allocation5], 4294966784  ;;  %s1484_s16 = smov 17   ;;  %s1485_s12 = smov 1   ;;  %633 = vmatprep.mubr.f32.mxu0 %v1487_v4  ;;  %783 = vmatprep.mubr.f32.mxu1 %v1487_v4  ;;  %v1724_v6 = vld [vmem:[%s370_s11] sm:$0xff]  ;;  %vm507_vm0 = vcmask 121856  }
  0x67   : > { %s1856_s17 = smov (!%p425_p6, %s1565_s17), 1  ;;  %s1488_s28 = smov 127   ;;  %1329 = vset.pattern.permute.xlu1 %v1489_v8  ;;  %1330 = vset.pattern.permute.xlu0 %v1489_v8  ;;  %v551_v9 = vld [vmem:[%s1830_s3 + $0x8] sm:$0xf]  ;;  %v1331_v10 = vpack.i.bf16 %v1726_v7, %v1724_v6  ;;  %v879_v12 = vld [vmem:[%s1833_s6] sm:$0xff]  ;;  %v441_v15 = vand.u32 127, %v440_v14 }
  0x68   : > { %s1705_s19 = sshll.u32 %s1856_s17, 4  ;;  %s1486_s17 = smov 16   ;;  %v880_v11 = vld [vmem:[%s1833_s6 + $0x8] sm:$0xf]  ;;  %v922_v13 = vld [vmem:[%s1835_s8] sm:$0x3f] }
  0x69   : > { %s429_s20 = scalar_lea.vmem %s1827_s0, %s1705_s19  ;;  %v442_v16 = vadd.s32 128, %v441_v15  ;;  %v447_v18 = vand.u32 15, %v441_v15  ;;  %vm475_vm1 = vcmask 138240   ;;  %vm530_vm2 = vcmask 7168   ;;  %v548_v54 = vld [vmem:[%s1829_s2] sm:$0xff]  ;;  %s434_s24 = scalar_lea.vmem %s1836_s9, %s1705_s19 }
  0x6a   : > { %v1711_v0 = vld [vmem:[%s429_s20] sm:$0xff]  ;;  %v1713_v1 = vld [vmem:[%s429_s20 + $0x8] sm:$0xff]  ;;  %vm498_vm3 = vcmask 130048   ;;  %vm1490_vm8 = vmmov 1   ;;  %vm541_vm11 = vcmask 1039360   ;;  %s439_s11 = scalar_lea.vmem %s1837_s10, %s1705_s19 }
  0x6b   : > { %v1314_v2 = vpack.i.bf16 %v1713_v1, %v1711_v0  ;;  %v1324_v3 = vpack.i.bf16 %v1711_v0, %v1713_v1  ;;  %v454_v17 = vand.u32 15, %v442_v16  ;;  %v1742_v22 = vadd.s32 4294967295, %v447_v18  ;;  %vm1173_vm6 = vmneg %vm498_vm3  ;;  %v549_v55 = vld [vmem:[%s1829_s2 + $0x8] sm:$0xf] }
  0x6c   : > { %v512_v30 = vadd.s32 1, %v447_v18  ;;  %v703_v18 = vld [vmem:[#allocation4] sm:$0xff] }
  0x6d   : > { %1315 = vrot.lane.b32.xlu1 %v1314_v2, %s1483_s18  ;;  %1305 = vrot.lane.b32.xlu0 %v1314_v2, %s1484_s16  ;;  %v481_v21 = vadd.s32 4294967295, %v454_v17  ;;  %v513_v23 = vadd.s32 1, %v454_v17  ;;  %vm482_vm5 = vcmp.ge.s32.totalorder %v1742_v22, 0  ;;  %v702_v22 = vld [vmem:[#allocation6 + $0x8] sm:$0xf] }
  0x6e   : > { %vm1204_vm10 = vmpackc.low %vm1173_vm6, %vm482_vm5  ;;  %vm516_vm13 = vcmp.lt.s32.totalorder %v512_v30, 16 }
  0x6f   : > { %vm483_vm4 = vcmp.ge.s32.totalorder %v481_v21, 0  ;;  %vm517_vm7 = vcmp.lt.s32.totalorder %v513_v23, 16  ;;  %vm1210_vm14 = vmpackc.low %vm482_vm5, %vm516_vm13 }
  0x70   : > { %vm1752_vm9 = vmpackc.low %vm1490_vm8, %vm483_vm4 }
  0x71   : > { %1320 = vrot.lane.b32.xlu1 %v1314_v2, %s1485_s12  ;;  %1310 = vrot.lane.b32.xlu0 %v1314_v2, %s1486_s17  ;;  %vm1207_vm12 = vmpackc.low %vm483_vm4, %vm517_vm7  ;;  %vm712_vm4 = vcmask 1043456  }
  0x72   : > { %vm1213_vm15 = vmpackc.low %vm517_vm7, %vm1490_vm8  ;;  %vm705_vm7 = vcmask 97280  }
  0x73   : > { %vm1219_vm6 = vmpackc.low %vm712_vm4, %vm1490_vm8 }
  0x75   : > { %1325 = vrot.lane.b32.xlu0 %v1324_v3, %s1488_s28  ;;  %554 = vperm.xlu1 %1329, %v550_v5  }
  0x79   : > { %559 = vperm.xlu0 %1330, %v551_v9   ;;  %1332 = vrot.lane.b32.xlu1 %v1331_v10, %s1485_s12 }
  0x7d   : > { %888 = vperm.xlu0 %1330, %v880_v11   ;;  %883 = vperm.xlu1 %1329, %v879_v12  }
  0x81   : > { %925 = vperm.xlu1 %1329, %v922_v13  }
  0xdf   : > { %v1316_v19 = vpop.permute.xlu1 %1315  ;;  %v1306_v20 = vpop.permute.xlu0 %1305 }
  0xe0   : > { %v1318_v24 = vunpack.i.h.bf16 %v1316_v19  ;;  %v1317_v25 = vunpack.i.l.bf16 %v1316_v19  ;;  %v1308_v26 = vunpack.i.h.bf16 %v1306_v20  ;;  %v1307_v27 = vunpack.i.l.bf16 %v1306_v20  ;;  %v704_v19 = vld [vmem:[#allocation4 + $0x8] sm:$0xf] }
  0xe2   : > { %v508_v35 = vsel %vm507_vm0, %v1317_v25, %v1318_v24  ;;  %v476_v37 = vsel %vm475_vm1, %v1307_v27, %v1308_v26  ;;  %v479_v40 = vsel %vm475_vm1, 0.0, %v1307_v27  ;;  %v511_v46 = vsel %vm507_vm0, 0.0, %v1317_v25  ;;  %vm1216_vm0 = vmpackc.low %vm516_vm13, %vm1490_vm8  ;;  %v701_v25 = vld [vmem:[#allocation6] sm:$0xff] }
  0xe3   : > { %v1321_v28 = vpop.permute.xlu1 %1320  ;;  %v1311_v29 = vpop.permute.xlu0 %1310  ;;  %vm562_vm1 = vcmask 392192  }
  0xe4   : > { %v1323_v31 = vunpack.i.h.bf16 %v1321_v28  ;;  %v1322_v32 = vunpack.i.l.bf16 %v1321_v28  ;;  %v1313_v33 = vunpack.i.h.bf16 %v1311_v29  ;;  %v1312_v34 = vunpack.i.l.bf16 %v1311_v29 }
  0xe6   : > { %v531_v36 = vsel %vm530_vm2, %v1322_v32, %v1323_v31  ;;  %v499_v38 = vsel %vm498_vm3, %v1312_v34, %v1313_v33  ;;  %v1203_v43 = vpack.c.bf16 %v1312_v34, %v479_v40  ;;  %v534_v47 = vsel %vm530_vm2, 0.0, %v1322_v32 }
  0xe7   : > { %v1200_v41 = vpack.c.bf16 %v499_v38, %v476_v37  ;;  %v1326_v42 = vpop.permute.xlu0 %1325  ;;  %v1206_v48 = vpack.c.bf16 %v531_v36, %v508_v35  ;;  %v1209_v52 = vpack.c.bf16 %v534_v47, %v511_v46 }
  0xe8   : > { %v1328_v44 = vunpack.i.h.bf16 %v1326_v42  ;;  %v1327_v45 = vunpack.i.l.bf16 %v1326_v42 }
  0xe9   : > { %1202 = vmatprep.subr.msk.bf16.mxu0 %vm1752_vm9, %v1200_v41 }
  0xea   : > { %1205 = vmatpush1.bf16.msk.msra.mxu0 %vm1204_vm10, %v1203_v43  ;;  %v545_v49 = vsel %vm541_vm11, %v1327_v45, 0.0  ;;  %v542_v50 = vsel %vm541_vm11, %v1328_v44, %v1327_v45  ;;  %vm1228_vm10 = vmpackc.low %vm1490_vm8, %vm482_vm5  ;;  %vm938_vm5 = vcmask 48128  }
  0xeb   : > { %v1212_v51 = vpack.c.bf16 %v545_v49, %v1713_v1  ;;  %1208 = vmatprep.subr.msk.bf16.mxu0 %vm1207_vm12, %v1206_v48  ;;  %v1215_v53 = vpack.c.bf16 %v542_v50, %v1711_v0 }
  0xee   : > { %1211 = vmatpush1.bf16.msk.msra.mxu0 %vm1210_vm14, %v1209_v52 }
  0xef   : > { %1214 = vmatprep.subr.msk.bf16.mxu0 %vm1213_vm15, %v1212_v51 }
  0xf2   : > { %1217 = vmatpush1.bf16.msk.msra.mxu0 %vm1216_vm0, %v1215_v53 }
  0xf4   : > { %v555_v56 = vpop.permute.xlu1 %554 }
  0xf5   : > { %1181 = vmatmul.mubr.msk.f32.vlgmr.msra.gmra.mrb[0].mxu0 %vm562_vm1, %v548_v54 }
  0xf6   : > { %639 = vmatprep.mubr.f32.mxu0 %v1487_v4 }
  0xf8   : > { %v1333_v57 = vpop.permute.xlu1 %1332  ;;  %v560_v1 = vpop.permute.xlu0 %559 }
  0xf9   : > { %1182 = vmatmul.mubr.msk.f32.gmra.mrb[2].mxu0 %vm562_vm1, %v549_v55  ;;  %v1335_v59 = vunpack.i.h.bf16 %v1333_v57  ;;  %v1334_v60 = vunpack.i.l.bf16 %v1333_v57 }
  0xfa   : > { %1011 = vmatprep.mubr.f32.mxu0 %v1487_v4 }
  0xfb   : > { %v695_v5 = vsel %vm530_vm2, %v1334_v60, %v1335_v59  ;;  %v698_v14 = vsel %vm530_vm2, 0.0, %v1334_v60  ;;  %vm676_vm2 = vcmask 1041408  }
  0xfc   : > { %v1224_v15 = vpack.c.bf16 %v1726_v7, %v695_v5  ;;  %v1227_v17 = vpack.c.bf16 %v1724_v6, %v698_v14  ;;  %v884_v43 = vpop.permute.xlu1 %883 }
 0x1c8   : > { %v635_v58 = vpop.f32.mrb[0].mxu0 }
 0x1c9   : > { %v636_v61 = vadd.f32 %v635_v58, %v555_v56  ;;  %v637_v62 = vpop.f32.mrb[1].mxu0  ;;  %v889_v58 = vpop.permute.xlu0 %888 }
 0x1ca   : > { %v638_v63 = vadd.f32 %v637_v62, %v555_v56 }
 0x1cb   : > { %v650_v0 = vsub.f32 0.0, %v636_v61  ;;  %v646_v28 = vmax.f32 %v636_v61, 0.0 }
 0x1cc   : > { %v651_v2 = vsub.f32 0.0, %v638_v63  ;;  %v641_v3 = vpop.f32.mrb[2].mxu0  ;;  %v647_v31 = vmax.f32 %v638_v63, 0.0 }
 0x1cd   : > { %v652_v8 = vmul.f32 1.442695, %v650_v0  ;;  %v642_v9 = vadd.f32 %v641_v3, %v560_v1  ;;  %v643_v10 = vpop.f32.mrb[3].mxu0 }
 0x1ce   : > { %v654_v11 = vmul.f32 1.442695, %v651_v2  ;;  %v644_v12 = vadd.f32 %v643_v10, %v560_v1 }
 0x1cf   : > { %1336 = vpow2.f32 %v652_v8  ;;  %v1221_v13 = vpack.c.bf16 %v642_v9, %v636_v61  ;;  %v648_v29 = vmax.f32 %v642_v9, 0.0 }
 0x1d0   : > { %1338 = vpow2.f32 %v654_v11  ;;  %v1218_v16 = vpack.c.bf16 %v644_v12, %v638_v63  ;;  %v649_v32 = vmax.f32 %v644_v12, 0.0 }
 0x1d2   : > { %1220 = vmatprep.subr.msk.bf16.mxu1 %vm1219_vm6, %v1218_v16 }
 0x1d3   : > { %1223 = vmatpush1.bf16.msk.msra.mxu1 %vm1219_vm6, %v1221_v13 }
 0x1d4   : > { %1226 = vmatprep.subr.msk.bf16.mxu1 %vm1752_vm9, %v1224_v15 }
 0x1d6   : > { %1185 = vmatmul.mubr.msk.f32.vlgmr.msra.gmra.mrb[0].mxu1 %vm705_vm7, %v703_v18  ;;  %v921_v18 = vld [vmem:[%s1834_s7] sm:$0x3f] }
 0x1d7   : > { %789 = vmatprep.mubr.f32.mxu1 %v1487_v4  ;;  %1229 = vmatpush1.bf16.msk.msra.mxu1 %vm1228_vm10, %v1227_v17 }
 0x1d9   : > { %v1337_v20 = vpop.eup %1336 }
 0x1da   : > { %v1339_v21 = vpop.eup %1338  ;;  %v656_v23 = vadd.f32 1.0, %v1337_v20  ;;  %1186 = vmatmul.mubr.msk.f32.gmra.mrb[2].mxu1 %vm705_vm7, %v704_v19  ;;  %v926_v19 = vpop.permute.xlu1 %925 }
 0x1db   : > { %v657_v24 = vadd.f32 1.0, %v1339_v21  ;;  %866 = vmatprep.mubr.f32.mxu1 %v1487_v4 }
 0x1dc   : > { %1340 = vrcp.f32 %v656_v23 }
 0x1dd   : > { %1342 = vrcp.f32 %v657_v24 }
 0x1de   : > { %1189 = vmatmul.mubr.msk.f32.vlgmr.msra.gmra.mrb[0].mxu1 %vm498_vm3, %v701_v25 }
 0x1df   : > { %872 = vmatprep.mubr.f32.mxu1 %v1487_v4 }
 0x1e2   : > { %1190 = vmatmul.mubr.msk.f32.gmra.mrb[2].mxu1 %vm498_vm3, %v702_v22  ;;  %vm942_vm3 = vcmask 1045504  }
 0x1e6   : > { %v1341_v26 = vpop.eup %1340 }
 0x1e7   : > { %v1343_v27 = vpop.eup %1342  ;;  %v664_v30 = vrot.slane %v1341_v26, 2 }
 0x1e8   : > { %v665_v33 = vrot.slane %v1343_v27, 2 }
 0x1e9   : > { %v668_v34 = vmul.f32 %v664_v30, %v646_v28  ;;  %v670_v35 = vmul.f32 %v664_v30, %v648_v29 }
 0x1ea   : > { %v669_v36 = vmul.f32 %v665_v33, %v647_v31  ;;  %v671_v37 = vmul.f32 %v665_v33, %v649_v32 }
 0x1eb   : > { %v677_v38 = vrot.slane %v668_v34, 6  ;;  %v678_v39 = vrot.slane %v670_v35, 6 }
 0x1ec   : > { %v680_v4 = vrot.slane %v669_v36, 6  ;;  %v681_v40 = vrot.slane %v671_v37, 6 }
 0x1ed   : > { %v679_v41 = vsel %vm676_vm2, %v677_v38, %v678_v39 }
 0x1ee   : > { %v682_v42 = vsel %vm676_vm2, %v680_v4, %v681_v40  ;;  %685 = vst [vmem:[%s434_s24] sm:$0x3f] %v679_v41 }
 0x1ef   : > { %686 = vst [vmem:[%s434_s24 + $0x8] sm:$0x3f] %v682_v42 }
 0x2b1   : > { %v868_v44 = vpop.f32.mrb[0].mxu1 }
 0x2b2   : > { %v891_v45 = vadd.f32 %v884_v43, %v868_v44  ;;  %v870_v46 = vpop.f32.mrb[1].mxu1 }
 0x2b3   : > { %v892_v47 = vadd.f32 %v884_v43, %v870_v46 }
 0x2b4   : > { %v899_v48 = vsub.f32 0.0, %v891_v45  ;;  %v895_v63 = vmax.f32 %v891_v45, 0.0 }
 0x2b5   : > { %v900_v49 = vsub.f32 0.0, %v892_v47  ;;  %v874_v50 = vpop.f32.mrb[2].mxu1  ;;  %v896_v2 = vmax.f32 %v892_v47, 0.0 }
 0x2b6   : > { %v901_v51 = vmul.f32 1.442695, %v899_v48  ;;  %v876_v52 = vpop.f32.mrb[3].mxu1  ;;  %v893_v59 = vadd.f32 %v889_v58, %v874_v50 }
 0x2b7   : > { %v903_v53 = vmul.f32 1.442695, %v900_v49  ;;  %v894_v60 = vadd.f32 %v889_v58, %v876_v52 }
 0x2b8   : > { %1344 = vpow2.f32 %v901_v51  ;;  %v897_v1 = vmax.f32 %v893_v59, 0.0 }
 0x2b9   : > { %1346 = vpow2.f32 %v903_v53  ;;  %v898_v5 = vmax.f32 %v894_v60, 0.0 }
 0x2c2   : > { %v1345_v54 = vpop.eup %1344 }
 0x2c3   : > { %v1347_v55 = vpop.eup %1346  ;;  %v905_v56 = vadd.f32 1.0, %v1345_v54 }
 0x2c4   : > { %v906_v57 = vadd.f32 1.0, %v1347_v55 }
 0x2c5   : > { %1348 = vrcp.f32 %v905_v56 }
 0x2c6   : > { %1350 = vrcp.f32 %v906_v57 }
 0x2cf   : > { %v1349_v61 = vpop.eup %1348 }
 0x2d0   : > { %v1351_v62 = vpop.eup %1350  ;;  %v913_v0 = vrot.slane %v1349_v61, 2 }
 0x2d1   : > { %v914_v3 = vrot.slane %v1351_v62, 2 }
 0x2d2   : > { %v917_v8 = vmul.f32 %v913_v0, %v895_v63  ;;  %v919_v9 = vmul.f32 %v913_v0, %v897_v1 }
 0x2d3   : > { %v918_v10 = vmul.f32 %v914_v3, %v896_v2  ;;  %v920_v11 = vmul.f32 %v914_v3, %v898_v5 }
 0x2d4   : > { %v932_v12 = vrot.slane %v917_v8, 6  ;;  %v933_v13 = vrot.slane %v919_v9, 6 }
 0x2d5   : > { %v935_v14 = vrot.slane %v918_v10, 6  ;;  %v936_v15 = vrot.slane %v920_v11, 6 }
 0x2d6   : > { %v934_v16 = vsel %vm676_vm2, %v932_v12, %v933_v13 }
 0x2d7   : > { %v937_v17 = vsel %vm676_vm2, %v935_v14, %v936_v15 }
 0x2d8   : > { %1191 = vmatprep.subr.msk.mxu0 %vm942_vm3, %v937_v17 }
 0x2d9   : > { %1192 = vmatpush1.msk.msra.mxu0 %vm942_vm3, %v934_v16 }
 0x2da   : > { %1193 = vmatmul.mubr.msk.f32.vlgmr.msra.gmra.mrb[4].mxu0 %vm938_vm5, %v921_v18 }
 0x3ad   : > { %v1013_v20 = vpop.f32.mrb[4].mxu0 }
 0x3ae   : > { %v1014_v21 = vadd.f32 %v1013_v20, %v926_v19  ;;  %v1015_v23 = vpop.f32.mrb[5].mxu0 }
 0x3af   : > { %v1016_v24 = vadd.f32 %v1015_v23, %v926_v19 }
 0x3b0   : > { %v1018_v25 = vadd.f32 %v1014_v21, %v1724_v6 }
 0x3b1   : > { %v1019_v22 = vadd.f32 %v1016_v24, %v1726_v7 }
 0x3b2   : > { %1020 = vst [vmem:[%s439_s11] sm:$0x3f] %v1018_v25 }
 0x3b3   : > { %1021 = vst [vmem:[%s439_s11 + $0x8] sm:$0x3f] %v1019_v22 }
 0x3b4 PF: > { %p22_p9 = scmp.ge.s32.totalorder %s1639_s26, 4   ;;  %s1851_s13 = smov %s1468_s14 }
 0x3b5   : > { %s1852_s14 = smov %s1472_s15  ;;  %s1853_s15 = smov %s1650_s29 }
 0x3b6   : > { %s1854_s16 = smov %s1639_s26  ;;  %24 = sbr.rel (!%p22_p9) target bundleno = 4 (0x4), region = 119 }
 0x3bd   :  { %1059 = vsyncpa [#allocation3], 1 }
 0x3be   :  { %1061 = vsyncpa [#allocation3 + $0x1], 1 }
 0x3bf   :  { %1062 = vsyncpa [#allocation5], 1 }

</bundles_post_ra>
